<compile_context>
chip_gen: v5e
topology: v5e:2x2
jax: 0.10.0
libtpu: 0.0.40
codegen_flags: <defaults>
</compile_context>

<pallas_src>
import jax
import jax.numpy as jnp
from jax.experimental import pallas as pl
from jax.experimental.pallas import tpu as pltpu


def _tpu_defaults():
    """(target_block_elems, vmem_limit_bytes) tuned per TPU generation."""
    try:
        kind = jax.devices()[0].device_kind.lower()
    except Exception:
        kind = ""
    if "v6" in kind:
        # v6e: 128 MiB physical VMEM, fast HBM -> bigger blocks amortize step overhead.
        return 2 * 1024 * 1024, 64 << 20
    if "v7" in kind:
        # v7x: only 64 MiB physical VMEM per TensorCore -> cap the footprint.
        return 1 * 1024 * 1024, 48 << 20
    # v5e / unknown: conservative; still well above the 16 MiB scoped default.
    return 1 * 1024 * 1024, 48 << 20


def dwt(x, *, target_block_elems=None, vmem_limit_bytes=None):
    """Pallas implementation of dwt_init / DWT.forward for NCHW input."""
    N, C, H, W = x.shape
    assert H % 2 == 0 and W % 2 == 0, "DWT requires even spatial dims"
    Ho, Wo = H // 2, W // 2
    Mc = C * Ho                      # number of (even,odd) input-row pairs per batch item
    itemsize = jnp.dtype(x.dtype).itemsize

    if target_block_elems is None or vmem_limit_bytes is None:
        tbe, vlim = _tpu_defaults()
        target_block_elems = target_block_elems or tbe
        vmem_limit_bytes = vmem_limit_bytes or vlim

    # Free reshape: (N, C, 2*Ho, W) -> (N, C*Ho, 2*W).  For fixed (n, c, ho) the 2*W
    # lane dim holds [even input row | odd input row].
    xv = x.reshape(N, Mc, 2 * W)

    # ---- row-block size: dtype-aware sublane multiple, bounded by VMEM budget ------
    row_align = max(8, 32 // itemsize)
    max_rows = max(row_align, target_block_elems // (2 * W))
    tm = min(Mc, max_rows)
    if tm < Mc:
        tm = max(row_align, (tm // row_align) * row_align)

    # Megacore (v7x): make sure there are enough grid steps to split across 2 cores.
    min_steps = 8
    want_j = -(-min_steps // max(N, 1))
    if want_j > 1 and Mc > row_align:
        cap = (Mc // want_j) // row_align * row_align
        if cap >= row_align:
            tm = min(tm, cap)

    # Prefer a tm that divides Mc exactly (avoids a partial trailing block).
    if 0 < tm < Mc:
        t = tm
        for _ in range(64):
            if Mc % t == 0 or t <= row_align:
                break
            t -= row_align
        if t >= row_align and Mc % t == 0:
            tm = t
    tm = max(1, min(tm, Mc))
    num_j = -(-Mc // tm)

    def kernel(x_ref, o_ref, st_ref, dt_ref):
        # x_ref: (tm, 2*W)   o_ref: (4, tm, Wo)   st/dt scratch: (W, tm) f32
        xr = x_ref[...].astype(jnp.float32)
        e = xr[:, :W]                         # even input rows (h = 2*ho)
        o = xr[:, W:]                         # odd  input rows (h = 2*ho + 1)
        s = (e + o) * 0.5                     # 0.5*(even + odd), columns still interleaved
        d = (o - e) * 0.5                     # 0.5*(odd - even)
        # Columns -> sublanes (XLU transpose), then deinterleave the column parity
        # with sublane-strided reads from VMEM scratch.
        st_ref[...] = s.T                     # (W, tm)
        dt_ref[...] = d.T
        s_ev = st_ref[pl.ds(0, Wo, stride=2), :]   # 0.5*(x1 + x2)   (Wo, tm)
        s_od = st_ref[pl.ds(1, Wo, stride=2), :]   # 0.5*(x3 + x4)
        d_ev = dt_ref[pl.ds(0, Wo, stride=2), :]   # 0.5*(x2 - x1)
        d_od = dt_ref[pl.ds(1, Wo, stride=2), :]   # 0.5*(x4 - x3)
        out_dt = o_ref.dtype
        o_ref[0] = (s_ev + s_od).T.astype(out_dt)  # LL =  x1 + x2 + x3 + x4
        o_ref[1] = (s_od - s_ev).T.astype(out_dt)  # HL = -x1 - x2 + x3 + x4
        o_ref[2] = (d_ev + d_od).T.astype(out_dt)  # LH = -x1 + x2 - x3 + x4
        o_ref[3] = (d_od - d_ev).T.astype(out_dt)  # HH =  x1 - x2 - x3 + x4

    grid = (N, num_j)
    in_spec = pl.BlockSpec((None, tm, 2 * W), lambda n, j: (n, j, 0))
    out_spec = pl.BlockSpec((None, 4, tm, Wo), lambda n, j: (n, 0, j, 0))

    nelem = x.size
    cost = pl.CostEstimate(flops=6 * nelem, transcendentals=0,
                           bytes_accessed=2 * nelem * itemsize)

    out = pl.pallas_call(
        kernel,
        grid=grid,
        in_specs=[in_spec],
        out_specs=out_spec,
        out_shape=jax.ShapeDtypeStruct((N, 4, Mc, Wo), x.dtype),
        scratch_shapes=[pltpu.VMEM((W, tm), jnp.float32),
                        pltpu.VMEM((W, tm), jnp.float32)],
        compiler_params=pltpu.CompilerParams(
            dimension_semantics=("parallel", "parallel"),
            vmem_limit_bytes=vmem_limit_bytes,
        ),
        cost_estimate=cost,
    )(xv)

    # (N, 4, C*Ho, Wo) is already in (N, 4, C, Ho, Wo) memory order -> free reshape.
    return out.reshape(N, 4 * C, Ho, Wo)


def _dwt_reference(x):
    """Pure-JAX transcription of the PyTorch dwt_init for verification."""
    x01 = x[:, :, 0::2, :] / 2
    x02 = x[:, :, 1::2, :] / 2
    x1 = x01[:, :, :, 0::2]
    x2 = x02[:, :, :, 0::2]
    x3 = x01[:, :, :, 1::2]
    x4 = x02[:, :, :, 1::2]
    x_LL = x1 + x2 + x3 + x4
    x_HL = -x1 - x2 + x3 + x4
    x_LH = -x1 + x2 - x3 + x4
    x_HH = x1 - x2 - x3 + x4
    return jnp.concatenate((x_LL, x_HL, x_LH, x_HH), axis=1)


if __name__ == "__main__":
    key = jax.random.PRNGKey(0)
    x = jax.random.normal(key, (2, 4, 16, 16), dtype=jnp.float32)

    out = jax.block_until_ready(jax.jit(dwt)(x))
    ref = _dwt_reference(x)

    assert out.shape == (2, 16, 8, 8), out.shape
    assert jnp.allclose(out, ref, atol=1e-5, rtol=1e-5), float(jnp.max(jnp.abs(out - ref)))
    print("KERNEL_OK")
</pallas_src>

<mosaic_0001>
module attributes {stable_mosaic.version = 11 : i64} {
  func.func @kernel(%arg0: i32, %arg1: i32, %arg2: memref<1x8x32xf32, #tpu.memory_space<vmem>>, %arg3: memref<1x4x8x8xf32, #tpu.memory_space<vmem>>, %arg4: memref<16x8xf32, #tpu.memory_space<vmem>>, %arg5: memref<16x8xf32, #tpu.memory_space<vmem>>) attributes {dimension_semantics = [#tpu.dimension_semantics<parallel>, #tpu.dimension_semantics<parallel>], iteration_bounds = array<i64: 2, 4>, scalar_prefetch = 0 : i64, scratch_operands = 2 : i64, tpu.core_type = #tpu.core_type<tc>, window_params = [{transform_indices = @transform_0, window_bounds = array<i64: 1, 8, 32>}, {transform_indices = @transform_1, window_bounds = array<i64: 1, 4, 8, 8>}]} {
    %c0 = arith.constant 0 : index
    %c0_0 = arith.constant 0 : index
    %c0_1 = arith.constant 0 : index
    %0 = vector.load %arg2[%c0, %c0_0, %c0_1] : memref<1x8x32xf32, #tpu.memory_space<vmem>>, vector<1x8x32xf32>
    %1 = vector.shape_cast %0 : vector<1x8x32xf32> to vector<8x32xf32>
    %2 = vector.extract_strided_slice %1 {offsets = [0, 0], sizes = [8, 16], strides = [1, 1]} : vector<8x32xf32> to vector<8x16xf32>
    %3 = vector.extract_strided_slice %1 {offsets = [0, 16], sizes = [8, 16], strides = [1, 1]} : vector<8x32xf32> to vector<8x16xf32>
    %4 = arith.addf %2, %3 : vector<8x16xf32>
    %cst = arith.constant 5.000000e-01 : f32
    %5 = vector.broadcast %cst : f32 to vector<8x16xf32>
    %6 = arith.mulf %4, %5 : vector<8x16xf32>
    %7 = arith.subf %3, %2 : vector<8x16xf32>
    %cst_2 = arith.constant 5.000000e-01 : f32
    %8 = vector.broadcast %cst_2 : f32 to vector<8x16xf32>
    %9 = arith.mulf %7, %8 : vector<8x16xf32>
    %10 = tpu.transpose %6, [1, 0] : vector<8x16xf32> -> vector<16x8xf32>
    %c0_3 = arith.constant 0 : index
    %c0_4 = arith.constant 0 : index
    %11 = vector.load %arg4[%c0_3, %c0_4] : memref<16x8xf32, #tpu.memory_space<vmem>>, vector<16x8xf32>
    tpu.vector_store %arg4[%c0_3, %c0_4], %10 {strides = array<i32>} : memref<16x8xf32, #tpu.memory_space<vmem>>, vector<16x8xf32>,
    %12 = tpu.transpose %9, [1, 0] : vector<8x16xf32> -> vector<16x8xf32>
    %c0_5 = arith.constant 0 : index
    %c0_6 = arith.constant 0 : index
    %13 = vector.load %arg5[%c0_5, %c0_6] : memref<16x8xf32, #tpu.memory_space<vmem>>, vector<16x8xf32>
    tpu.vector_store %arg5[%c0_5, %c0_6], %12 {strides = array<i32>} : memref<16x8xf32, #tpu.memory_space<vmem>>, vector<16x8xf32>,
    %c0_7 = arith.constant 0 : index
    %c0_8 = arith.constant 0 : index
    %14 = tpu.strided_load %arg4[%c0_7, %c0_8] {strides = array<i32: 2, 1>} : memref<16x8xf32, #tpu.memory_space<vmem>>, vector<8x8xf32>
    %c1 = arith.constant 1 : index
    %c0_9 = arith.constant 0 : index
    %15 = tpu.strided_load %arg4[%c1, %c0_9] {strides = array<i32: 2, 1>} : memref<16x8xf32, #tpu.memory_space<vmem>>, vector<8x8xf32>
    %c0_10 = arith.constant 0 : index
    %c0_11 = arith.constant 0 : index
    %16 = tpu.strided_load %arg5[%c0_10, %c0_11] {strides = array<i32: 2, 1>} : memref<16x8xf32, #tpu.memory_space<vmem>>, vector<8x8xf32>
    %c1_12 = arith.constant 1 : index
    %c0_13 = arith.constant 0 : index
    %17 = tpu.strided_load %arg5[%c1_12, %c0_13] {strides = array<i32: 2, 1>} : memref<16x8xf32, #tpu.memory_space<vmem>>, vector<8x8xf32>
    %18 = arith.addf %14, %15 : vector<8x8xf32>
    %19 = tpu.transpose %18, [1, 0] : vector<8x8xf32> -> vector<8x8xf32>
    %c0_14 = arith.constant 0 : index
    %c0_15 = arith.constant 0 : index
    %c0_16 = arith.constant 0 : index
    %c0_17 = arith.constant 0 : index
    %20 = vector.load %arg3[%c0_14, %c0_15, %c0_16, %c0_17] : memref<1x4x8x8xf32, #tpu.memory_space<vmem>>, vector<1x1x8x8xf32>
    %21 = vector.shape_cast %20 : vector<1x1x8x8xf32> to vector<8x8xf32>
    %22 = vector.shape_cast %19 : vector<8x8xf32> to vector<1x1x8x8xf32>
    tpu.vector_store %arg3[%c0_14, %c0_15, %c0_16, %c0_17], %22 {strides = array<i32>} : memref<1x4x8x8xf32, #tpu.memory_space<vmem>>, vector<1x1x8x8xf32>,
    %23 = arith.subf %15, %14 : vector<8x8xf32>
    %24 = tpu.transpose %23, [1, 0] : vector<8x8xf32> -> vector<8x8xf32>
    %c0_18 = arith.constant 0 : index
    %c1_19 = arith.constant 1 : index
    %c0_20 = arith.constant 0 : index
    %c0_21 = arith.constant 0 : index
    %25 = vector.load %arg3[%c0_18, %c1_19, %c0_20, %c0_21] : memref<1x4x8x8xf32, #tpu.memory_space<vmem>>, vector<1x1x8x8xf32>
    %26 = vector.shape_cast %25 : vector<1x1x8x8xf32> to vector<8x8xf32>
    %27 = vector.shape_cast %24 : vector<8x8xf32> to vector<1x1x8x8xf32>
    tpu.vector_store %arg3[%c0_18, %c1_19, %c0_20, %c0_21], %27 {strides = array<i32>} : memref<1x4x8x8xf32, #tpu.memory_space<vmem>>, vector<1x1x8x8xf32>,
    %28 = arith.addf %16, %17 : vector<8x8xf32>
    %29 = tpu.transpose %28, [1, 0] : vector<8x8xf32> -> vector<8x8xf32>
    %c0_22 = arith.constant 0 : index
    %c2 = arith.constant 2 : index
    %c0_23 = arith.constant 0 : index
    %c0_24 = arith.constant 0 : index
    %30 = vector.load %arg3[%c0_22, %c2, %c0_23, %c0_24] : memref<1x4x8x8xf32, #tpu.memory_space<vmem>>, vector<1x1x8x8xf32>
    %31 = vector.shape_cast %30 : vector<1x1x8x8xf32> to vector<8x8xf32>
    %32 = vector.shape_cast %29 : vector<8x8xf32> to vector<1x1x8x8xf32>
    tpu.vector_store %arg3[%c0_22, %c2, %c0_23, %c0_24], %32 {strides = array<i32>} : memref<1x4x8x8xf32, #tpu.memory_space<vmem>>, vector<1x1x8x8xf32>,
    %33 = arith.subf %17, %16 : vector<8x8xf32>
    %34 = tpu.transpose %33, [1, 0] : vector<8x8xf32> -> vector<8x8xf32>
    %c0_25 = arith.constant 0 : index
    %c3 = arith.constant 3 : index
    %c0_26 = arith.constant 0 : index
    %c0_27 = arith.constant 0 : index
    %35 = vector.load %arg3[%c0_25, %c3, %c0_26, %c0_27] : memref<1x4x8x8xf32, #tpu.memory_space<vmem>>, vector<1x1x8x8xf32>
    %36 = vector.shape_cast %35 : vector<1x1x8x8xf32> to vector<8x8xf32>
    %37 = vector.shape_cast %34 : vector<8x8xf32> to vector<1x1x8x8xf32>
    tpu.vector_store %arg3[%c0_25, %c3, %c0_26, %c0_27], %37 {strides = array<i32>} : memref<1x4x8x8xf32, #tpu.memory_space<vmem>>, vector<1x1x8x8xf32>,
    return
  }
  func.func @transform_0(%arg0: i32, %arg1: i32) -> (i32, i32, i32) {
    %c0_i32 = arith.constant 0 : i32
    %c0_i32_0 = arith.constant 0 : i32
    return %arg0, %arg1, %c0_i32 : i32, i32, i32
  }
  func.func @transform_1(%arg0: i32, %arg1: i32) -> (i32, i32, i32, i32) {
    %c0_i32 = arith.constant 0 : i32
    %c0_i32_0 = arith.constant 0 : i32
    %c0_i32_1 = arith.constant 0 : i32
    return %arg0, %c0_i32, %arg1, %c0_i32_0 : i32, i32, i32, i32
  }
}

</mosaic_0001>

<bundles_post_ra>
// kernel: dwt.1
= control target key start
LH: loop header
LB: loop body
LE: loop exit
PB: predicated region body
PF: predicated region fallthrough
CT: control target
= control target key end

     0   :  { %s635_s6 = smov 0   ;;  %s637_s7 = smov 0   ;;  %s738_s0 = inlined_call_operand.vmem [shape: f32[2,32,32], index: 0, kind: input, shape index: {}]   ;;  %s739_s1 = inlined_call_operand.vmem [shape: f32[2,4,32,8], index: 1, kind: output, shape index: {}]  }
   0x1   :  { %s639_s8 = smov 0   ;;  %s641_s9 = smov 0  }
   0x2   :  { %s643_s10 = smov 0   ;;  %s645_s11 = smov 0  }
   0x3   :  { %s647_s12 = smov 0  }
   0x4 LB: > { %s20_s13 = sadd.s32 1, %s613_s10  ;;  %s23_s14 = sadd.s32 1, %s617_s11  ;;  %s621_s12 = sphi %s647_s12, %s11_s12   ;;  %s617_s11 = sphi %s645_s11, %s746_s11   ;;  %s613_s10 = sphi %s643_s10, %s745_s10   ;;  %s609_s9 = sphi %s641_s9, %s744_s9   ;;  %s605_s8 = sphi %s639_s8, %s743_s8   ;;  %s601_s7 = sphi %s637_s7, %s742_s7   ;;  %s597_s6 = sphi %s635_s6, %s741_s6  }
   0x5   : > { %p21_p0 = scmp.ge.s32.totalorder %s20_s13, 4  ;;  %s492_s15 = sadd.s32 4294967295, %s621_s12  }
   0x6   : > { %p70_p1 = scmp.ne.s32.totalorder %s601_s7, %s597_s6  ;;  %p71_p2 = scmp.eq.s32.totalorder %s492_s15, 7 }
   0x7   : > { %s748_s13 = smov (%p21_p0, %s20_s13), 0  ;;  %s750_s14 = smov (!%p21_p0, %s23_s14), %s617_s11 }
   0x8   : > { %s56_s16 = ssub.s32 %s613_s10, %s748_s13  ;;  %p25_p3 = scmp.ge.s32.totalorder %s750_s14, 2 }
   0x9   : > { %p496_p4 = scmp.ge.s32.totalorder %s621_s12, 1  ;;  %p681_p5 = por %p71_p2, %p70_p1 }
   0xa   : > { %p106_p6 = scmp.lt.s32.totalorder %s621_s12, 9  ;;  %s752_s14 = smov (%p25_p3, %s750_s14), 0 }
   0xb   : > { %s55_s18 = ssub.s32 %s617_s11, %s752_s14  ;;  %s60_s20 = sadd.s32 1, %s601_s7 }
   0xc   : > { %p107_p7 = pnand %p496_p4, %p106_p6  ;;  %s57_s19 = sor.u32 %s56_s16, %s55_s18 }
   0xd   : > { %p58_p8 = scmp.eq.s32.totalorder %s57_s19, 0  ;;  %p128_p9 = scmp.lt.s32.totalorder (!%p107_p7), %s609_s9, 1 }
   0xe   : > { %110 = sbr.rel (%p107_p7) target bundleno = 603 (0x25b), region = 24  ;;  %p130_p10 = scmp.lt.s32.totalorder (!%p107_p7), %s605_s8, 3 }
   0xf   : > { %s692_s21 = scalar_select %p58_p8, %s601_s7, %s60_s20  }
  0x10   : > { %s623_s30 = smov (!%p107_p7), 16   ;;  %s624_s2 = smov (!%p107_p7), 112  }
  0x11   : > { %s125_s3 = sand.u32 (!%p107_p7), 1, %s597_s6  }
  0x12   : > { %s497_s4 = sshll.u32 (!%p107_p7), %s125_s3, 5 }
  0x13   : > { %s129_s22 = scalar_select %p128_p9, %s609_s9, 1  ;;  %vm180_vm0 = vcmask 64512  }
  0x14   : > { %s131_s23 = scalar_select %p130_p10, %s605_s8, 3 }
  0x15   : > { %s498_s24 = sshll.u32 %s129_s22, 2  ;;  %s127_s5 = scalar_lea.vmem [#allocation4], %s497_s4 }
  0x16   : > { %s133_s25 = sadd.s32 %s498_s24, %s131_s23  ;;  %s504_s6 = sshll.u32 (%p681_p5), %s609_s9, 4 }
  0x17   : > { %s499_s26 = sshll.u32 %s133_s25, 3  ;;  %s374_s15 = sadd.s32 (%p681_p5), %s605_s8, %s504_s6 }
  0x18   : > { %s135_s29 = scalar_lea.vmem %s738_s0, %s499_s26  ;;  %s505_s16 = sshll.u32 (%p681_p5), %s374_s15, 3 }
  0x19   : > { %v136_v0 = vld [vmem:[%s135_s29] sm:$0xff]  ;;  %s376_s20 = scalar_lea.vmem (%p681_p5), %s739_s1, %s505_s16 }
  0x1a   : > { %143 = vrot.lane.b32.xlu0 %v136_v0, %s623_s30 }
  0x22   : > { %138 = vrot.lane.b32.xlu0 %v136_v0, %s624_s2 }
  0x8c   : > { %v144_v1 = vpop.permute.xlu0 %143 }
  0x8d   : > { %v146_v2 = vsub.f32 %v136_v0, %v144_v1 }
  0x8f   : > { %v147_v3 = vmul.f32 0.5, %v146_v2 }
  0x91   : > { %184 = vrot.lane.b32.xlu1 %v147_v3, %s624_s2 }
  0x94   : > { %v139_v4 = vpop.permute.xlu0 %138 }
  0x95   : > { %v141_v5 = vadd.f32 %v139_v4, %v136_v0 }
  0x97   : > { %v142_v6 = vmul.f32 0.5, %v141_v5 }
  0xc6   : > { %148 = vxpose.xlu1.b32.start.end [1/1] (short) (narrow) %v142_v6, 16 }
 0x103   : > { %v185_v7 = vpop.permute.xlu1 %184 }
 0x104   : > { %187 = vxpose.xlu2.b32.start.end [1/1] (short) (narrow) %v185_v7, 16 }
 0x16a   : > { %v164_v8 = vpop.trf.xlu1 }
 0x16b   : > { %181 = vst.msk [vmem:[#allocation2] sm:$0xff] %vm180_vm0, %v164_v8 }
 0x172   : > { %v165_v9 = vpop.trf.xlu1 }
 0x173   : > { %182 = vst.msk [vmem:[#allocation2 + $0x8] sm:$0xff] %vm180_vm0, %v165_v9 }
 0x17a   : > { %v221_v10 = vld [vmem:[#allocation2] ss:$2 sm:$0xff]  ;;  %v223_v11 = vld [vmem:[#allocation2 + $0x1] ss:$2 sm:$0xff] }
 0x17b   : > { %v261_v12 = vsub.f32 %v223_v11, %v221_v10  ;;  %v227_v13 = vadd.f32 %v223_v11, %v221_v10 }
 0x17d   : > { %262 = vxpose.xlu0.b32.start.end [1/1] (short) (narrow) %v261_v12, 8  ;;  %228 = vxpose.xlu2.b32.start.end [1/1] (short) (narrow) %v227_v13, 8 }
 0x19d   : > { %v203_v14 = vpop.trf.xlu2 }
 0x19e   : > { %219 = vst.msk [vmem:[#allocation3] sm:$0xff] %vm180_vm0, %v203_v14 }
 0x1a5   : > { %v204_v15 = vpop.trf.xlu2 }
 0x1a6   : > { %220 = vst.msk [vmem:[#allocation3 + $0x8] sm:$0xff] %vm180_vm0, %v204_v15 }
 0x1ad   : > { %v224_v16 = vld [vmem:[#allocation3] ss:$2 sm:$0xff]  ;;  %v226_v17 = vld [vmem:[#allocation3 + $0x1] ss:$2 sm:$0xff] }
 0x1ae   : > { %v296_v18 = vadd.f32 %v226_v17, %v224_v16  ;;  %v331_v19 = vsub.f32 %v226_v17, %v224_v16 }
 0x1b0   : > { %297 = vxpose.xlu2.b32.start.end [1/1] (short) (narrow) %v296_v18, 8 }
 0x1b8   : > { %332 = vxpose.xlu2.b32.start.end [1/1] (short) (narrow) %v331_v19, 8 }
 0x216   : > { %v244_v20 = vpop.trf.xlu2 }
 0x217   : > { %260 = vst.msk [vmem:[%s127_s5] sm:$0xff] %vm180_vm0, %v244_v20 }
 0x21e   : > { %v411_v24 = vld [vmem:[%s127_s5] sm:$0xff] (%p681_p5) }
 0x21f   : > { %412 = vst [vmem:[%s376_s20] sm:$0xff] (%p681_p5), %v411_v24 }
 0x221   : > { %v278_v21 = vpop.trf.xlu0 }
 0x222   : > { %500 = vst.msk [vmem:[%s127_s5 + $0x8] sm:$0xff] %vm180_vm0, %v278_v21 }
 0x229   : > { %v413_v25 = vld [vmem:[%s127_s5 + $0x8] sm:$0xff] (%p681_p5) }
 0x22a   : > { %414 = vst [vmem:[%s376_s20 + $0x20] sm:$0xff] (%p681_p5), %v413_v25 }
 0x249   : > { %v313_v22 = vpop.trf.xlu2 }
 0x24a   : > { %501 = vst.msk [vmem:[%s127_s5 + $0x10] sm:$0xff] %vm180_vm0, %v313_v22 }
 0x24e   : > { %372 = sbr.rel (!%p681_p5) target bundleno = 603 (0x25b), region = 28 }
 0x251   : > { %v348_v23 = vpop.trf.xlu2  ;;  %v415_v26 = vld [vmem:[%s127_s5 + $0x10] sm:$0xff] (%p681_p5) }
 0x252   : > { %502 = vst.msk [vmem:[%s127_s5 + $0x18] sm:$0xff] %vm180_vm0, %v348_v23 }
 0x253   : > { %416 = vst [vmem:[%s376_s20 + $0x40] sm:$0xff] %v415_v26 }
 0x259   : > { %v417_v27 = vld [vmem:[%s127_s5 + $0x18] sm:$0xff] }
 0x25a   : > { %418 = vst [vmem:[%s376_s20 + $0x60] sm:$0xff] %v417_v27 }
 0x25b PF: > { %s11_s12 = sadd.s32 1, %s621_s12   ;;  %s741_s6 = smov %s601_s7 }
 0x25c   : > { %p8_p11 = scmp.ge.s32.totalorder %s11_s12, 10   ;;  %s742_s7 = smov %s692_s21 }
 0x25d   : > { %s743_s8 = smov %s613_s10  ;;  %s744_s9 = smov %s617_s11 }
 0x25e   : > { %s745_s10 = smov %s748_s13  ;;  %s746_s11 = smov %s752_s14 }
 0x25f   :  { %10 = sbr.rel (!%p8_p11) target bundleno = 4 (0x4), region = 97 }

</bundles_post_ra>
